<compile_context>
chip_gen: v7x
topology: tpu7x:2x2x1
jax: 0.10.0
libtpu: 0.0.40
codegen_flags: <defaults>
</compile_context>

<pallas_src>
import functools

import jax
import jax.numpy as jnp
from jax import lax
from jax.experimental import pallas as pl
from jax.experimental.pallas import tpu as pltpu


# ----------------------------------------------------------------------------
# Kernel 1: per-source-node messages  msg = (X @ W) * D^-1/2_src
# ----------------------------------------------------------------------------
def _msg_kernel(x_ref, w_ref, norm_ref, msg_ref):
    xw = jnp.dot(x_ref[...], w_ref[...], preferred_element_type=jnp.float32)
    msg_ref[...] = xw * norm_ref[...]


# ----------------------------------------------------------------------------
# Kernel 2: tiled aggregation  h = PReLU( (A @ msg) * D^-1/2_dst + b )
#           + per-row-tile BatchNorm partials (sum, sum of squares)
# grid = (row tiles i  [parallel], contraction tiles k [arbitrary])
# ----------------------------------------------------------------------------
def _conv_kernel(a_ref, msg_ref, norm_ref, b_ref, slope_ref,
                 h_ref, stats_ref, acc_ref):
    k = pl.program_id(1)

    @pl.when(k == 0)
    def _():
        acc_ref[...] = jnp.zeros_like(acc_ref)

    # A is streamed as bf16 (exact for 0/1 adjacency) to halve HBM bytes; upcast
    # in-registers so the matmul matches f32 semantics exactly.
    a_blk = a_ref[...].astype(jnp.float32)
    acc_ref[...] += jnp.dot(a_blk, msg_ref[...],
                            preferred_element_type=jnp.float32)

    @pl.when(k == pl.num_programs(1) - 1)
    def _():
        slope = slope_ref[0, 0]                              # SMEM scalar
        h = acc_ref[...] * norm_ref[...] + b_ref[...]        # dst norm + bias
        h = jnp.where(h >= 0.0, h, slope * h)                # GraphConv PReLU
        h_ref[...] = h

        # one-pass BatchNorm partials for this row tile: rows 0=sum, 1=sum(x^2)
        s = jnp.sum(h, axis=0, keepdims=True)                # (1, F_pad)
        sq = jnp.sum(h * h, axis=0, keepdims=True)           # (1, F_pad)
        rows = lax.broadcasted_iota(jnp.int32, (8, h.shape[1]), 0)
        blk = jnp.where(rows == 0, s, jnp.where(rows == 1, sq, 0.0))
        stats_ref[0] = blk


# ----------------------------------------------------------------------------
# Kernel 3: BatchNorm (training-mode batch stats) + outer PReLU
# grid = (row tiles i [parallel])
# ----------------------------------------------------------------------------
def _bn_act_kernel(h_ref, sum_ref, sumsq_ref, gamma_ref, beta_ref, slope_ref,
                   o_ref, *, inv_n):
    mean = sum_ref[...] * inv_n                               # (1, F_pad)
    var = sumsq_ref[...] * inv_n - mean * mean                # biased variance
    scale = gamma_ref[...] * lax.rsqrt(var + 1e-5)
    shift = beta_ref[...] - mean * scale
    h = h_ref[...] * scale + shift
    slope = slope_ref[0, 0]                                   # SMEM scalar
    o_ref[...] = jnp.where(h >= 0.0, h, slope * h)


# ----------------------------------------------------------------------------
# Wrapper
# ----------------------------------------------------------------------------
def encoder1_forward(A, feat, W, b, a_conv, gamma, beta, a_act, *, tm=128, tk=128):
    N = A.shape[0]
    F_in = feat.shape[1]
    F_out = W.shape[1]
    F_pad = ((F_out + 127) // 128) * 128     # lane-dense output width
    pad = F_pad - F_out

    tm = min(tm, N)
    tk = min(tk, N)
    assert N % tm == 0 and N % tk == 0, "demo requires N divisible by the tile sizes"
    num_i = N // tm
    num_k = N // tk

    # TODO(synk): Dropout(p1) is identity in eval mode; train-mode masking would
    # use pltpu.prng_seed + pltpu.stateful_bernoulli inside the msg kernel.

    # static per-graph degree normalization (DGL norm='both'; deg clamped >=1,
    # harmless here because self-loops guarantee deg>=1)
    A = A.astype(jnp.float32)
    deg = jnp.sum(A, axis=1, keepdims=True)
    norm = lax.rsqrt(jnp.maximum(deg, 1.0))                   # (N, 1) f32
    A_bf16 = A.astype(jnp.bfloat16)                           # exact for 0/1 adjacency

    W_p = jnp.pad(W.astype(jnp.float32), ((0, 0), (0, pad)))
    b_p = jnp.pad(b.astype(jnp.float32), (0, pad)).reshape(1, F_pad)
    gamma_p = jnp.pad(gamma.astype(jnp.float32), (0, pad)).reshape(1, F_pad)
    beta_p = jnp.pad(beta.astype(jnp.float32), (0, pad)).reshape(1, F_pad)
    a_conv_s = jnp.asarray(a_conv, jnp.float32).reshape(1, 1)
    a_act_s = jnp.asarray(a_act, jnp.float32).reshape(1, 1)

    # ---- kernel 1: msg = (X @ W) * D^-1/2_src ------------------------------
    msg = pl.pallas_call(
        _msg_kernel,
        out_shape=jax.ShapeDtypeStruct((N, F_pad), jnp.float32),
        grid=(num_k,),
        in_specs=[
            pl.BlockSpec((tk, F_in), lambda k: (k, 0)),
            pl.BlockSpec((F_in, F_pad), lambda k: (0, 0)),
            pl.BlockSpec((tk, 1), lambda k: (k, 0)),
        ],
        out_specs=pl.BlockSpec((tk, F_pad), lambda k: (k, 0)),
        compiler_params=pltpu.CompilerParams(dimension_semantics=("parallel",)),
    )(feat.astype(jnp.float32), W_p, norm)

    # ---- kernel 2: tiled aggregation + GraphConv PReLU + BN partials -------
    # VMEM per step (tm=tk=128): A 32KiB + msg 64KiB + out 64KiB (x2 buffers)
    # + 64KiB accumulator — well under the 32 MiB scoped default on all of
    # v5e/v6e/v7x; re-derive tiles for v7x (64 MiB total) before growing them.
    h, stats = pl.pallas_call(
        _conv_kernel,
        out_shape=(
            jax.ShapeDtypeStruct((N, F_pad), jnp.float32),
            jax.ShapeDtypeStruct((num_i, 8, F_pad), jnp.float32),
        ),
        grid=(num_i, num_k),
        in_specs=[
            pl.BlockSpec((tm, tk), lambda i, k: (i, k)),          # A (bf16)
            pl.BlockSpec((tk, F_pad), lambda i, k: (k, 0)),       # msg
            pl.BlockSpec((tm, 1), lambda i, k: (i, 0)),           # D^-1/2 dst
            pl.BlockSpec((1, F_pad), lambda i, k: (0, 0)),        # bias
            pl.BlockSpec(memory_space=pltpu.MemorySpace.SMEM),    # PReLU slope
        ],
        out_specs=(
            pl.BlockSpec((tm, F_pad), lambda i, k: (i, 0)),       # h
            pl.BlockSpec((1, 8, F_pad), lambda i, k: (i, 0, 0)),  # per-tile stats
        ),
        scratch_shapes=[pltpu.VMEM((tm, F_pad), jnp.float32)],
        compiler_params=pltpu.CompilerParams(
            dimension_semantics=("parallel", "arbitrary")),
    )(A_bf16, msg, norm, b_p, a_conv_s)

    # tiny cross-tile reduction of the BatchNorm partials (num_i x F_pad)
    sum_h = jnp.sum(stats[:, 0, :], axis=0, keepdims=True)        # (1, F_pad)
    sumsq_h = jnp.sum(stats[:, 1, :], axis=0, keepdims=True)      # (1, F_pad)

    # ---- kernel 3: BatchNorm + outer PReLU ---------------------------------
    out_p = pl.pallas_call(
        functools.partial(_bn_act_kernel, inv_n=1.0 / N),
        out_shape=jax.ShapeDtypeStruct((N, F_pad), jnp.float32),
        grid=(num_i,),
        in_specs=[
            pl.BlockSpec((tm, F_pad), lambda i: (i, 0)),
            pl.BlockSpec((1, F_pad), lambda i: (0, 0)),
            pl.BlockSpec((1, F_pad), lambda i: (0, 0)),
            pl.BlockSpec((1, F_pad), lambda i: (0, 0)),
            pl.BlockSpec((1, F_pad), lambda i: (0, 0)),
            pl.BlockSpec(memory_space=pltpu.MemorySpace.SMEM),
        ],
        out_specs=pl.BlockSpec((tm, F_pad), lambda i: (i, 0)),
        compiler_params=pltpu.CompilerParams(dimension_semantics=("parallel",)),
    )(h, sum_h, sumsq_h, gamma_p, beta_p, a_act_s)

    return out_p[:, :F_out]


# ----------------------------------------------------------------------------
# Pure-JAX reference
# ----------------------------------------------------------------------------
def encoder1_reference(A, feat, W, b, a_conv, gamma, beta, a_act):
    hi = lax.Precision.HIGHEST
    deg = jnp.sum(A, axis=1, keepdims=True)
    norm = 1.0 / jnp.sqrt(jnp.maximum(deg, 1.0))
    xw = jnp.dot(feat, W, precision=hi)
    h = jnp.dot(A, xw * norm, precision=hi) * norm + b[None, :]
    h = jnp.where(h >= 0.0, h, a_conv * h)
    mean = jnp.mean(h, axis=0, keepdims=True)
    var = jnp.mean((h - mean) ** 2, axis=0, keepdims=True)
    h = (h - mean) / jnp.sqrt(var + 1e-5)
    h = h * gamma[None, :] + beta[None, :]
    return jnp.where(h >= 0.0, h, a_act * h)


if __name__ == "__main__":
    N, IN_HIDDEN, OUT_HIDDEN = 256, 32, 16

    key = jax.random.PRNGKey(0)
    k_adj, k_feat, k_w = jax.random.split(key, 3)

    # deterministic symmetric 0/1 adjacency with self-loops
    upper = (jax.random.uniform(k_adj, (N, N)) < 0.05).astype(jnp.float32)
    A = jnp.clip(upper + upper.T + jnp.eye(N, dtype=jnp.float32), 0.0, 1.0)

    feat = jax.random.normal(k_feat, (N, IN_HIDDEN), dtype=jnp.float32)

    # deterministic parameters (matching the module's __init__ shapes/defaults)
    W = jax.random.normal(k_w, (IN_HIDDEN, OUT_HIDDEN), dtype=jnp.float32) * (
        1.0 / jnp.sqrt(jnp.float32(IN_HIDDEN))
    )
    b = jnp.zeros((OUT_HIDDEN,), jnp.float32)         # GraphConv bias
    a_conv = jnp.float32(0.25)                        # PReLU slope inside GraphConv
    gamma = jnp.ones((OUT_HIDDEN,), jnp.float32)      # BatchNorm weight
    beta = jnp.zeros((OUT_HIDDEN,), jnp.float32)      # BatchNorm bias
    a_act = jnp.float32(0.25)                         # outer PReLU slope

    out = encoder1_forward(A, feat, W, b, a_conv, gamma, beta, a_act)
    out = jax.block_until_ready(out)

    ref = encoder1_reference(A, feat, W, b, a_conv, gamma, beta, a_act)
    assert out.shape == (N, OUT_HIDDEN)
    assert jnp.allclose(out, ref, atol=1e-3, rtol=1e-3), "mismatch vs reference"

    print("KERNEL_OK")
</pallas_src>

<mosaic_0001>
module attributes {stable_mosaic.version = 11 : i64} {
  func.func @_msg_kernel(%arg0: i32, %arg1: memref<128x32xf32, #tpu.memory_space<vmem>>, %arg2: memref<32x128xf32, #tpu.memory_space<vmem>>, %arg3: memref<128x1xf32, #tpu.memory_space<vmem>>, %arg4: memref<128x128xf32, #tpu.memory_space<vmem>>) attributes {dimension_semantics = [#tpu.dimension_semantics<parallel>], iteration_bounds = array<i64: 2>, scalar_prefetch = 0 : i64, scratch_operands = 0 : i64, tpu.core_type = #tpu.core_type<tc>, window_params = [{transform_indices = @transform_0, window_bounds = array<i64: 128, 32>}, {pipeline_mode = #tpu.pipeline_mode<synchronous>, transform_indices = @transform_1, window_bounds = array<i64: 32, 128>}, {transform_indices = @transform_2, window_bounds = array<i64: 128, 1>}, {transform_indices = @transform_3, window_bounds = array<i64: 128, 128>}]} {
    %c0 = arith.constant 0 : index
    %c0_0 = arith.constant 0 : index
    %0 = vector.load %arg1[%c0, %c0_0] : memref<128x32xf32, #tpu.memory_space<vmem>>, vector<128x32xf32>
    %c0_1 = arith.constant 0 : index
    %c0_2 = arith.constant 0 : index
    %1 = vector.load %arg2[%c0_1, %c0_2] : memref<32x128xf32, #tpu.memory_space<vmem>>, vector<32x128xf32>
    %cst = arith.constant dense<0.000000e+00> : vector<128x128xf32>
    %2 = tpu.matmul %0, %1, %cst {dimension_numbers = #tpu.dot_dimension_numbers<[1], [0], [0], [1], [0, 0, 1, 1], [], []>} : vector<128x32xf32>, vector<32x128xf32>, vector<128x128xf32> -> vector<128x128xf32>
    %c0_3 = arith.constant 0 : index
    %c0_4 = arith.constant 0 : index
    %3 = vector.load %arg3[%c0_3, %c0_4] : memref<128x1xf32, #tpu.memory_space<vmem>>, vector<128x1xf32>
    %4 = vector.broadcast %3 : vector<128x1xf32> to vector<128x128xf32>
    %5 = arith.mulf %2, %4 : vector<128x128xf32>
    %c0_5 = arith.constant 0 : index
    %c0_6 = arith.constant 0 : index
    %6 = vector.load %arg4[%c0_5, %c0_6] : memref<128x128xf32, #tpu.memory_space<vmem>>, vector<128x128xf32>
    tpu.vector_store %arg4[%c0_5, %c0_6], %5 {strides = array<i32>} : memref<128x128xf32, #tpu.memory_space<vmem>>, vector<128x128xf32>,
    return
  }
  func.func @transform_0(%arg0: i32) -> (i32, i32) {
    %c0_i32 = arith.constant 0 : i32
    %c0_i32_0 = arith.constant 0 : i32
    return %arg0, %c0_i32 : i32, i32
  }
  func.func @transform_1(%arg0: i32) -> (i32, i32) {
    %c0_i32 = arith.constant 0 : i32
    %c0_i32_0 = arith.constant 0 : i32
    %c0_i32_1 = arith.constant 0 : i32
    return %c0_i32, %c0_i32_0 : i32, i32
  }
  func.func @transform_2(%arg0: i32) -> (i32, i32) {
    %c0_i32 = arith.constant 0 : i32
    %c0_i32_0 = arith.constant 0 : i32
    return %arg0, %c0_i32 : i32, i32
  }
  func.func @transform_3(%arg0: i32) -> (i32, i32) {
    %c0_i32 = arith.constant 0 : i32
    %c0_i32_0 = arith.constant 0 : i32
    return %arg0, %c0_i32 : i32, i32
  }
}

</mosaic_0001>

<bundles_post_ra>
// kernel: tpu_custom_call.1
= control target key start
LH: loop header
LB: loop body
LE: loop exit
PB: predicated region body
PF: predicated region fallthrough
CT: control target
= control target key end

     0   :  { %8 = vsyncpa [#allocation3], 0  ;;  %s1043_s0 = inlined_call_operand.vmem [shape: f32[256,32], index: 0, kind: input, shape index: {}]   ;;  %s1044_s1 = inlined_call_operand.vmem [shape: f32[32,128], index: 1, kind: input, shape index: {}]   ;;  %s1045_s2 = inlined_call_operand.vmem [shape: f32[256,1], index: 2, kind: input, shape index: {}]   ;;  %s1046_s3 = inlined_call_operand.hbm [shape: f32[256,128], index: 3, kind: output, shape index: {}]  }
   0x1   :  { %10 = vsyncpa [#allocation3 + $0x1], 0  ;;  %s851_s12 = smov 0   ;;  %s853_s13 = smov 0  }
   0x2   :  { %s855_s14 = smov 0   ;;  %s857_s15 = smov 0  }
   0x3 LB: > { %s872_s16 = sadd.s32 4294967295, %s825_s15   ;;  %s624_s17 = sadd.s32 4294967294, %s825_s15   ;;  %s825_s15 = sphi %s857_s15, %s1052_s15   ;;  %s821_s14 = sphi %s855_s14, %s1051_s14   ;;  %s817_s13 = sphi %s853_s13, %s1050_s13   ;;  %s813_s12 = sphi %s851_s12, %s1049_s12  }
   0x4   : > { %s876_s18 = sadd.s32 1, %s825_s15   ;;  %s96_s19 = sadd.s32 1, %s821_s14 }
   0x5   : > { %s93_s20 = ssub.s32 %s825_s15, %s876_s18  ;;  %p106_p0 = scmp.ne.s32.totalorder %s821_s14, %s817_s13 }
   0x6   : > { %p94_p1 = scmp.eq.s32.totalorder %s93_s20, 0  ;;  %p107_p2 = scmp.eq.s32.totalorder %s872_s16, 1 }
   0x7   : > { %p112_p3 = scmp.ne.s32.totalorder %s817_s13, %s813_s12  ;;  %p113_p4 = scmp.eq.s32.totalorder %s624_s17, 1 }
   0x8   : > { %s887_s21 = scalar_select %p94_p1, %s821_s14, %s96_s19  }
   0x9   : > { %p889_p5 = por %p107_p2, %p106_p0  ;;  %p893_p6 = por %p113_p4, %p112_p3 }
   0xa   : > { %p627_p7 = scmp.ge.s32.totalorder %s825_s15, 1  ;;  %p152_p8 = scmp.lt.s32.totalorder %s825_s15, 3 }
   0xc   : > { %p153_p9 = pnand %p627_p7, %p152_p8 }
   0xd   : > { %v210_v0 = vld [vmem:[%s1044_s1] sm:$0xff] (!%p153_p9)  ;;  %v211_v1 = vld [vmem:[%s1044_s1 + $0x8] sm:$0xff] (!%p153_p9)  ;;  %v212_v2 = vld [vmem:[%s1044_s1 + $0x10] sm:$0xff] (!%p153_p9)  ;;  %s629_s30 = sshll.u32 (!%p153_p9), %s872_s16, 4  ;;  %v827_v5 = vmov (!%p153_p9), 0   ;;  %vm214_vm0 = vcmask (!%p153_p9), 261120  }
   0xe   : > { %156 = sbr.rel (%p153_p9) target bundleno = 269 (0x10d), region = 32  ;;  %v707_v3 = vpack.c.bf16 (!%p153_p9), %v211_v1, %v210_v0  ;;  %v213_v4 = vld [vmem:[%s1044_s1 + $0x18] sm:$0xff] (!%p153_p9)  ;;  %p182_p10 = scmp.lt.s32.totalorder (!%p153_p9), %s629_s30, 31  ;;  %762 = vset.pattern.permute.xlu1 (!%p153_p9), %v827_v5  ;;  %761 = vset.pattern.permute.xlu0 (!%p153_p9), %v827_v5 }
   0xf   : > { %v711_v6 = vpack.c.bf16 (!%p153_p9), %v213_v4, %v212_v2  ;;  %s178_s19 = sand.u32 (!%p153_p9), 1, %s817_s13   ;;  %s654_s25 = sshll.u32 (!%p153_p9), %s872_s16, 11 }
  0x10   : > { %708 = vmatprep.subr.bf16.mxu0 (!%p153_p9), %v707_v3  ;;  %715 = vmatprep.subr.bf16.mxu1 (!%p153_p9), %v707_v3  ;;  %s628_s20 = sshll.u32 (!%p153_p9), %s178_s19, 7  ;;  %s992_s28 = scalar_lea.hbm (!%p153_p9), %s1046_s3, %s654_s25 }
  0x11   : > { %710 = vmatpush3.bf16.msra.mxu0 (!%p153_p9), %v707_v3  ;;  %717 = vmatpush3.bf16.msra.mxu1 (!%p153_p9), %v707_v3  ;;  %s973_s24 = scalar_lea.vmem (!%p153_p9), [#allocation2], %s628_s20  ;;  %s1002_s29 = scalar_lea.sflag (!%p153_p9), [#allocation3], %s178_s19 }
  0x12   : > { %712 = vmatprep.subr.bf16.mxu0 (!%p153_p9), %v711_v6  ;;  %716 = vmatprep.subr.bf16.mxu1 (!%p153_p9), %v711_v6  ;;  %s550_s26 = sshll.u32 (!%p153_p9), %s973_s24, 4  ;;  %s828_s4 = smov (!%p153_p9), [#allocation2]   ;;  %s994_s26 = int_to_ptr.vmem [resolvable:$true] %s550_s26 }
  0x13   : > { %s767_s5 = sshll.u32 (!%p153_p9), %s828_s4, 4  ;;  %s768_s5 = int_to_ptr.vmem [resolvable:$false] %s767_s5 }
  0x14   : > { %p770_p0 = scmp.lt.s32.totalorder (!%p153_p9), %s994_s26, %s768_s5 }
  0x15   : > { %s1054_s30 = smov (!%p182_p10, %s629_s30), 31  ;;  %714 = vmatpush3.bf16.msra.mxu0 %v711_v6  ;;  %718 = vmatpush3.bf16.msra.mxu1 %v711_v6 }
  0x16   : > { %s630_s6 = sshll.u32 %s1054_s30, 3  ;;  %s763_s30 = scalar_lea.vmem %s994_s26, 2048 }
  0x17   : > { %s915_s9 = scalar_lea.vmem %s1043_s0, %s630_s6  ;;  %s928_s17 = scalar_lea.vmem %s1045_s2, %s630_s6 }
  0x18   : > { %v194_v7 = vld [vmem:[%s915_s9] sm:$0xff]  ;;  %v195_v9 = vld [vmem:[%s915_s9 + $0x8] sm:$0xff]  ;;  %v196_v11 = vld [vmem:[%s915_s9 + $0x10] sm:$0xff]  ;;  %p764_p11 = scmp.ne.s32.totalorder %s994_s26, %s763_s30  ;;  %s769_s6 = scalar_lea.vmem %s768_s5, 4096 }
  0x19   : > { %v202_v8 = vld [vmem:[%s915_s9 + $0x40] sm:$0xff]  ;;  %v203_v10 = vld [vmem:[%s915_s9 + $0x48] sm:$0xff]  ;;  %683 = vmatprep.mubr.msk.f32.mxu0 %vm214_vm0, %v194_v7  ;;  %v204_v12 = vld [vmem:[%s915_s9 + $0x50] sm:$0xff]  ;;  %p771_p1 = scmp.lt.s32.totalorder %s769_s6, %s763_s30 }
  0x1a   : > { %695 = vmatprep.mubr.msk.f32.mxu1 %vm214_vm0, %v202_v8  ;;  %684 = vmatmul.mubr.msk.f32.vlgmr.msra.gmra.mrb[0].mxu0 %vm214_vm0, %v195_v9  ;;  %v197_v13 = vld [vmem:[%s915_s9 + $0x18] sm:$0xff]  ;;  %v410_v15 = vld [vmem:[%s928_s17 + $0x10] sm:$0xff]  ;;  %v408_v16 = vld [vmem:[%s928_s17] sm:$0xff]  ;;  %p765_p12 = pnand %p764_p11, %p889_p5 }
  0x1b   : > { %696 = vmatmul.mubr.msk.f32.vlgmr.msra.gmra.mrb[0].mxu1 %vm214_vm0, %v203_v10  ;;  %686 = vmatprep.mubr.msk.f32.mxu0 %vm214_vm0, %v196_v11  ;;  %v205_v14 = vld [vmem:[%s915_s9 + $0x58] sm:$0xff]  ;;  %v198_v17 = vld [vmem:[%s915_s9 + $0x20] sm:$0xff]  ;;  %v409_v20 = vld [vmem:[%s928_s17 + $0x8] sm:$0xff]  ;;  %p772_p2 = por %p771_p1, %p770_p0 }
  0x1c   : > { %698 = vmatprep.mubr.msk.f32.mxu1 %vm214_vm0, %v204_v12  ;;  %v206_v18 = vld [vmem:[%s915_s9 + $0x60] sm:$0xff]  ;;  %436 = vperm.xlu1 %762, %v410_v15   ;;  %v411_v19 = vld [vmem:[%s928_s17 + $0x18] sm:$0xff]  ;;  %v199_v21 = vld [vmem:[%s915_s9 + $0x28] sm:$0xff]  ;;  %p766_p13 = pneg %p765_p12 }
  0x1d   : > { %426 = vperm.xlu0 %761, %v408_v16   ;;  %v207_v22 = vld [vmem:[%s915_s9 + $0x68] sm:$0xff]  ;;  %v200_v23 = vld [vmem:[%s915_s9 + $0x30] sm:$0xff]  ;;  %v412_v26 = vld [vmem:[%s928_s17 + $0x20] sm:$0xff] }
  0x1e   : > { %687 = vmatmul.mubr.msk.f32.gmra.mrb[2].mxu0 %vm214_vm0, %v197_v13  ;;  %v208_v24 = vld [vmem:[%s915_s9 + $0x70] sm:$0xff]  ;;  %v413_v25 = vld [vmem:[%s928_s17 + $0x28] sm:$0xff]  ;;  %v201_v27 = vld [vmem:[%s915_s9 + $0x38] sm:$0xff]  ;;  %p773_p3 = pnand %p772_p2, %p766_p13 }
  0x1f   : > { %699 = vmatmul.mubr.msk.f32.gmra.mrb[2].mxu1 %vm214_vm0, %v205_v14  ;;  %689 = vmatprep.mubr.msk.f32.mxu0 %vm214_vm0, %v198_v17  ;;  %v209_v28 = vld [vmem:[%s915_s9 + $0x78] sm:$0xff]  ;;  %v414_v30 = vld [vmem:[%s928_s17 + $0x30] sm:$0xff]  ;;  %v417_v31 = vld [vmem:[%s928_s17 + $0x48] sm:$0xff] }
  0x20   : > { %701 = vmatprep.mubr.msk.f32.mxu1 %vm214_vm0, %v206_v18  ;;  %441 = vperm.xlu1 %762, %v411_v19   ;;  %v415_v29 = vld [vmem:[%s928_s17 + $0x38] sm:$0xff]  ;;  %v416_v32 = vld [vmem:[%s928_s17 + $0x40] sm:$0xff]  ;;  %v418_v34 = vld [vmem:[%s928_s17 + $0x50] sm:$0xff] }
  0x21   : > { %431 = vperm.xlu0 %761, %v409_v20   ;;  %v419_v33 = vld [vmem:[%s928_s17 + $0x58] sm:$0xff]  ;;  %v421_v35 = vld [vmem:[%s928_s17 + $0x68] sm:$0xff]  ;;  %v420_v36 = vld [vmem:[%s928_s17 + $0x60] sm:$0xff] }
  0x22   : > { %690 = vmatmul.mubr.msk.f32.gmra.mrb[4].mxu0 %vm214_vm0, %v199_v21  ;;  %v423_v37 = vld [vmem:[%s928_s17 + $0x78] sm:$0xff]  ;;  %v422_v38 = vld [vmem:[%s928_s17 + $0x70] sm:$0xff] }
  0x23   : > { %702 = vmatmul.mubr.msk.f32.gmra.mrb[4].mxu1 %vm214_vm0, %v207_v22  ;;  %692 = vmatprep.mubr.msk.f32.mxu0 %vm214_vm0, %v200_v23 }
  0x24   : > { %704 = vmatprep.mubr.msk.f32.mxu1 %vm214_vm0, %v208_v24  ;;  %451 = vperm.xlu1 %762, %v413_v25  }
  0x25   : > { %446 = vperm.xlu0 %761, %v412_v26  }
  0x26   : > { %693 = vmatmul.mubr.msk.f32.gmra.mrb[6].mxu0 %vm214_vm0, %v201_v27 }
  0x27   : > { %705 = vmatmul.mubr.msk.f32.gmra.mrb[6].mxu1 %vm214_vm0, %v209_v28 }
  0x28   : > { %461 = vperm.xlu1 %762, %v415_v29  }
  0x29   : > { %456 = vperm.xlu0 %761, %v414_v30  }
  0x2c   : > { %471 = vperm.xlu1 %762, %v417_v31  }
  0x2d   : > { %466 = vperm.xlu0 %761, %v416_v32  }
  0x30   : > { %481 = vperm.xlu1 %762, %v419_v33  }
  0x31   : > { %476 = vperm.xlu0 %761, %v418_v34  }
  0x34   : > { %491 = vperm.xlu1 %762, %v421_v35  }
  0x35   : > { %486 = vperm.xlu0 %761, %v420_v36  }
  0x38   : > { %501 = vperm.xlu1 %762, %v423_v37  }
  0x39   : > { %496 = vperm.xlu0 %761, %v422_v38  }
  0x9b   : > { %v437_v39 = vpop.permute.xlu1 %436 }
  0x9c   : > { %v427_v40 = vpop.permute.xlu0 %426 }
  0x9f   : > { %v442_v41 = vpop.permute.xlu1 %441 }
  0xa0   : > { %v432_v42 = vpop.permute.xlu0 %431 }
  0xa3   : > { %v452_v43 = vpop.permute.xlu1 %451 }
  0xa4   : > { %v447_v44 = vpop.permute.xlu0 %446 }
  0xa7   : > { %v462_v45 = vpop.permute.xlu1 %461 }
  0xa8   : > { %v457_v46 = vpop.permute.xlu0 %456 }
  0xab   : > { %v472_v47 = vpop.permute.xlu1 %471 }
  0xac   : > { %v467_v48 = vpop.permute.xlu0 %466 }
  0xaf   : > { %v482_v49 = vpop.permute.xlu1 %481 }
  0xb0   : > { %v477_v50 = vpop.permute.xlu0 %476 }
  0xb3   : > { %v492_v59 = vpop.permute.xlu1 %491 }
  0xb4   : > { %v487_v60 = vpop.permute.xlu0 %486 }
  0xb7   : > { %v502_v13 = vpop.permute.xlu1 %501 }
  0xb8   : > { %v497_v14 = vpop.permute.xlu0 %496 }
  0xed   : > { %v685_v51 = vpop.f32.mrb[0].mxu0 }
  0xee   : > { %v697_v52 = vpop.f32.mrb[0].mxu1  ;;  %v505_v53 = vmul.f32 %v685_v51, %v432_v42  ;;  %v329_v55 = vpop.f32.mrb[1].mxu0 }
  0xef   : > { %v513_v54 = vmul.f32 %v697_v52, %v472_v47  ;;  %v369_v56 = vpop.f32.mrb[1].mxu1  ;;  %v504_v57 = vmul.f32 %v427_v40, %v329_v55 }
  0xf0   : > { %v512_v58 = vmul.f32 %v467_v48, %v369_v56  ;;  %521 = vst [vmem:[%s973_s24 + $0x8] sm:$0xff] %v505_v53 }
  0xf1   : > { %529 = vst [vmem:[%s973_s24 + $0x48] sm:$0xff] %v513_v54  ;;  %520 = vst [vmem:[%s973_s24] sm:$0xff] %v504_v57  ;;  %v688_v61 = vpop.f32.mrb[2].mxu0 }
  0xf2   : > { %528 = vst [vmem:[%s973_s24 + $0x40] sm:$0xff] %v512_v58  ;;  %v700_v62 = vpop.f32.mrb[2].mxu1  ;;  %v507_v63 = vmul.f32 %v688_v61, %v442_v41  ;;  %v339_v1 = vpop.f32.mrb[3].mxu0 }
  0xf3   : > { %v515_v0 = vmul.f32 %v700_v62, %v482_v49  ;;  %v379_v2 = vpop.f32.mrb[3].mxu1  ;;  %v506_v3 = vmul.f32 %v437_v39, %v339_v1 }
  0xf4   : > { %v514_v4 = vmul.f32 %v477_v50, %v379_v2  ;;  %523 = vst [vmem:[%s973_s24 + $0x18] sm:$0xff] %v507_v63 }
  0xf5   : > { %531 = vst [vmem:[%s973_s24 + $0x58] sm:$0xff] %v515_v0  ;;  %522 = vst [vmem:[%s973_s24 + $0x10] sm:$0xff] %v506_v3  ;;  %v691_v5 = vpop.f32.mrb[4].mxu0 }
  0xf6   : > { %530 = vst [vmem:[%s973_s24 + $0x50] sm:$0xff] %v514_v4  ;;  %v703_v6 = vpop.f32.mrb[4].mxu1  ;;  %v509_v7 = vmul.f32 %v691_v5, %v452_v43  ;;  %v349_v9 = vpop.f32.mrb[5].mxu0 }
  0xf7   : > { %v517_v8 = vmul.f32 %v703_v6, %v492_v59  ;;  %v389_v10 = vpop.f32.mrb[5].mxu1  ;;  %v508_v11 = vmul.f32 %v447_v44, %v349_v9 }
  0xf8   : > { %v516_v12 = vmul.f32 %v487_v60, %v389_v10  ;;  %525 = vst [vmem:[%s973_s24 + $0x28] sm:$0xff] %v509_v7 }
  0xf9   : > { %533 = vst [vmem:[%s973_s24 + $0x68] sm:$0xff] %v517_v8  ;;  %524 = vst [vmem:[%s973_s24 + $0x20] sm:$0xff] %v508_v11  ;;  %v694_v15 = vpop.f32.mrb[6].mxu0 }
  0xfa   : > { %532 = vst [vmem:[%s973_s24 + $0x60] sm:$0xff] %v516_v12  ;;  %v706_v16 = vpop.f32.mrb[6].mxu1  ;;  %v511_v17 = vmul.f32 %v694_v15, %v462_v45  ;;  %v359_v19 = vpop.f32.mrb[7].mxu0 }
  0xfb   : > { %v519_v18 = vmul.f32 %v706_v16, %v502_v13  ;;  %v399_v20 = vpop.f32.mrb[7].mxu1  ;;  %v510_v21 = vmul.f32 %v457_v46, %v359_v19 }
  0xfc   : > { %v518_v22 = vmul.f32 %v497_v14, %v399_v20  ;;  %527 = vst [vmem:[%s973_s24 + $0x38] sm:$0xff] %v511_v17 }
  0xfd   : > { %535 = vst [vmem:[%s973_s24 + $0x78] sm:$0xff] %v519_v18  ;;  %526 = vst [vmem:[%s973_s24 + $0x30] sm:$0xff] %v510_v21 }
  0xfe   : > { %534 = vst [vmem:[%s973_s24 + $0x70] sm:$0xff] %v518_v22 }
  0xff   : > { %776 = shalt.err (!%p773_p3)
}
 0x100   : > { %s777_s7 = scalar_lea.hbm %s992_s28, 2048  ;;  %s781_s10 = scalar_lea.hbm %s1046_s3, 4096 }
 0x101   : > { %p778_p4 = scmp.ne.s32.totalorder %s992_s28, %s777_s7  ;;  %p782_p9 = scmp.lt.u32.totalorder %s992_s28, %s1046_s3 }
 0x102   : > { %p783_p10 = scmp.lt.u32.totalorder %s781_s10, %s777_s7  ;;  %p785_p12 = scmp.lt.u32.totalorder %s777_s7, %s992_s28 }
 0x103   : > { %p779_p7 = pnand %p778_p4, %p889_p5 }
 0x104   : > { %p784_p11 = por %p783_p10, %p782_p9 }
 0x105   : > { %p780_p8 = pneg %p779_p7 }
 0x106   : > { %p786_p13 = por %p785_p12, %p784_p11 }
 0x108   : > { %p787_p0 = pnand %p786_p13, %p780_p8 }
 0x10a   : > { %790 = shalt.err (!%p787_p0)
}
 0x10b   : > { %s829_s19 = smov 128   ;;  %s830_s20 = smov 8  }
 0x10c   : > { %719 = dma.vmem_to_hbm [thread:$0]  (%p889_p5), %s994_s26, 2048, %s992_s28, %s1002_s29, %s829_s19, %s829_s19, %s830_s20  }
 0x10d PF: > { %p725_p1 = scmp.ge.s32.totalorder %s825_s15, 2  ;;  %s565_s24 = sand.u32 1, %s813_s12  }
 0x10e   : > { %s566_s25 = scalar_lea.sflag [#allocation3], %s565_s24 }
 0x10f   : > { %p722_p2 = pnand %p725_p1, %p893_p6 }
 0x111   : > { %808 = dma.done.wait (!%p722_p2), %s566_s25, 2048  }
 0x112   : > { %810 = vsyncadd (!%p722_p2), %s566_s25, 4294965248  ;;  %p13_p3 = scmp.ge.s32.totalorder %s876_s18, 4   ;;  %s1049_s12 = smov %s817_s13 }
 0x113   : > { %s1050_s13 = smov %s821_s14  ;;  %s1051_s14 = smov %s887_s21 }
 0x114   : > { %s1052_s15 = smov %s876_s18  ;;  %15 = sbr.rel (!%p13_p3) target bundleno = 3 (0x3), region = 70 }
 0x11b   :  { %571 = vsyncpa [#allocation3], 1 }
 0x11c   :  { %573 = vsyncpa [#allocation3 + $0x1], 1 }

</bundles_post_ra>
